<compile_context>
chip_gen: v7x
topology: tpu7x:2x2x1
jax: 0.10.0
libtpu: 0.0.40
codegen_flags: <defaults>
</compile_context>

<pallas_src>
import functools
import string

import jax
import jax.numpy as jnp
from jax import lax
from jax.experimental import pallas as pl
from jax.experimental.pallas import tpu as pltpu

N_CHARS = len(string.printable)   # 100 (== CharTensor.n_characters)
HIDDEN = 100                      # hidden_size from the module
N_LAYERS = 1

# Lane-padded sizes (multiples of 128 for dense stores / full MXU columns).
H_PAD = 128
N_PAD = 128
H3 = 3 * H_PAD


# --------------------------------------------------------------------------- #
# Kernel: whole sequence in one invocation.  gi rows (x@W_i + biases) are
# precomputed; per step only the h @ W_h matmul + gate math runs; the decoder
# matmul is batched after the loop.
# --------------------------------------------------------------------------- #
def gru_seq_kernel(gi_ref,            # (seq_pad, 3*H_PAD)  precomputed W_i x + fused biases per step
                   h0_ref,            # (8, H_PAD)          initial hidden in row 0
                   wh_ref,            # (H_PAD, 3*H_PAD)    fused hidden gate weights [W_hr|W_hz|W_hn]
                   bhn_ref,           # (8, H_PAD)          hidden-side n-gate bias in row 0
                   wdec_ref,          # (H_PAD, N_PAD)      decoder weights
                   bdec_ref,          # (8, N_PAD)          decoder bias in row 0
                   logits_ref,        # out: (seq_pad, N_PAD)
                   hseq_ref,          # out: (seq_pad, H_PAD) hidden state per step
                   *, seq_len):
    # Zero the hidden-state slab (padded rows stay 0 and are sliced off outside).
    hseq_ref[...] = jnp.zeros_like(hseq_ref)

    bhn = bhn_ref[0:1, :]             # (1, H_PAD), loaded once

    def step(t, h):
        # gi = W_ir x + b_ir + b_hr | W_iz x + b_iz + b_hz | W_in x + b_in  (table row)
        gi = gi_ref[pl.ds(t, 1), :]                                            # (1, 3*H_PAD)
        gh = jnp.dot(h, wh_ref[...], preferred_element_type=jnp.float32)       # (1, 3*H_PAD)

        # PyTorch GRU cell (gate order r, z, n):
        #   r = sigmoid(W_ir x + b_ir + W_hr h + b_hr)
        #   z = sigmoid(W_iz x + b_iz + W_hz h + b_hz)
        #   n = tanh(W_in x + b_in + r * (W_hn h + b_hn))
        #   h' = (1 - z) * n + z * h  ==  n + z * (h - n)
        r = jax.nn.sigmoid(gi[:, 0:H_PAD] + gh[:, 0:H_PAD])
        z = jax.nn.sigmoid(gi[:, H_PAD:2 * H_PAD] + gh[:, H_PAD:2 * H_PAD])
        n = jnp.tanh(gi[:, 2 * H_PAD:] + r * (gh[:, 2 * H_PAD:] + bhn))
        h_new = n + z * (h - n)

        hseq_ref[pl.ds(t, 1), :] = h_new
        return h_new

    lax.fori_loop(0, seq_len, step, h0_ref[0:1, :])

    # Batched decoder (one real MXU-shaped matmul, single dense output store).
    logits_ref[...] = (jnp.dot(hseq_ref[...], wdec_ref[...],
                               preferred_element_type=jnp.float32)
                       + bdec_ref[0:1, :]).astype(logits_ref.dtype)


# --------------------------------------------------------------------------- #
# Parameter construction / packing
# --------------------------------------------------------------------------- #
def make_params(key, hidden=HIDDEN, n_chars=N_CHARS):
    """Deterministic synthetic parameters matching the PyTorch module's shapes
    (already transposed to x @ W layout)."""
    ks = jax.random.split(key, 16)
    s = 0.1
    return {
        "emb":  jax.random.normal(ks[0], (n_chars, hidden), jnp.float32) * s,
        "wir":  jax.random.normal(ks[1], (hidden, hidden), jnp.float32) * s,
        "wiz":  jax.random.normal(ks[2], (hidden, hidden), jnp.float32) * s,
        "win":  jax.random.normal(ks[3], (hidden, hidden), jnp.float32) * s,
        "whr":  jax.random.normal(ks[4], (hidden, hidden), jnp.float32) * s,
        "whz":  jax.random.normal(ks[5], (hidden, hidden), jnp.float32) * s,
        "whn":  jax.random.normal(ks[6], (hidden, hidden), jnp.float32) * s,
        "bir":  jax.random.normal(ks[7], (1, hidden), jnp.float32) * s,
        "biz":  jax.random.normal(ks[8], (1, hidden), jnp.float32) * s,
        "bin":  jax.random.normal(ks[9], (1, hidden), jnp.float32) * s,
        "bhr":  jax.random.normal(ks[10], (1, hidden), jnp.float32) * s,
        "bhz":  jax.random.normal(ks[11], (1, hidden), jnp.float32) * s,
        "bhn":  jax.random.normal(ks[12], (1, hidden), jnp.float32) * s,
        "wdec": jax.random.normal(ks[13], (hidden, n_chars), jnp.float32) * s,
        "bdec": jax.random.normal(ks[14], (1, n_chars), jnp.float32) * s,
    }


def _pad2(a, rows, cols):
    """Zero-pad a 2D array up to (rows, cols)."""
    return jnp.zeros((rows, cols), a.dtype).at[:a.shape[0], :a.shape[1]].set(a)


def pack_params(p):
    """Fuse + lane-pad parameters into the kernel's layout (done once, on host)."""
    wi = jnp.concatenate([_pad2(p["wir"], H_PAD, H_PAD),
                          _pad2(p["wiz"], H_PAD, H_PAD),
                          _pad2(p["win"], H_PAD, H_PAD)], axis=1)          # (H_PAD, 3*H_PAD)
    bi = jnp.concatenate([_pad2(p["bir"] + p["bhr"], 1, H_PAD),
                          _pad2(p["biz"] + p["bhz"], 1, H_PAD),
                          _pad2(p["bin"], 1, H_PAD)], axis=1)              # (1, 3*H_PAD)
    # Embedding folded through W_i: x @ W_i is a pure table lookup.
    emb_proj = _pad2(p["emb"], N_CHARS, H_PAD) @ wi + bi                   # (N_CHARS, 3*H_PAD)
    wh = jnp.concatenate([_pad2(p["whr"], H_PAD, H_PAD),
                          _pad2(p["whz"], H_PAD, H_PAD),
                          _pad2(p["whn"], H_PAD, H_PAD)], axis=1)          # (H_PAD, 3*H_PAD)
    return {
        "emb_proj": emb_proj,
        "wh":       wh,
        "bhn":      _pad2(p["bhn"], 8, H_PAD),       # bias in row 0, 8 sublanes for (8,128) tiling
        "wdec":     _pad2(p["wdec"], H_PAD, N_PAD),
        "bdec":     _pad2(p["bdec"], 8, N_PAD),
    }


# --------------------------------------------------------------------------- #
# Wrappers
# --------------------------------------------------------------------------- #
def rnn_forward_seq(char_indices, hidden, kp):
    """Run the RNN forward over a whole character sequence in one pallas_call.

    char_indices: int32 (seq_len,)
    hidden:       float32 (n_layers=1, 1, HIDDEN)
    kp:           packed params from pack_params()
    returns:      (logits (seq_len, N_CHARS), new_hidden (1, 1, HIDDEN))
    """
    seq_len = int(char_indices.shape[0])
    seq_pad = max(8, -(-seq_len // 8) * 8)     # sublane multiple of 8

    # Precomputed gi rows (embedding folded through W_i) — gather off critical path.
    gi_rows = jnp.take(kp["emb_proj"], char_indices.astype(jnp.int32), axis=0)   # (seq_len, 3*H_PAD)
    gi_seq = jnp.zeros((seq_pad, H3), jnp.float32).at[:seq_len].set(gi_rows)

    h0 = jnp.zeros((8, H_PAD), jnp.float32).at[0, :HIDDEN].set(
        hidden.reshape(HIDDEN).astype(jnp.float32))

    full = lambda shape: pl.BlockSpec(shape, lambda i: (0, 0))

    logits_pad, hseq_pad = pl.pallas_call(
        functools.partial(gru_seq_kernel, seq_len=seq_len),
        out_shape=(
            jax.ShapeDtypeStruct((seq_pad, N_PAD), jnp.float32),
            jax.ShapeDtypeStruct((seq_pad, H_PAD), jnp.float32),
        ),
        grid=(1,),
        in_specs=[
            full((seq_pad, H3)),      # gi_seq
            full((8, H_PAD)),         # h0
            full((H_PAD, H3)),        # wh
            full((8, H_PAD)),         # bhn
            full((H_PAD, N_PAD)),     # wdec
            full((8, N_PAD)),         # bdec
        ],
        out_specs=(
            full((seq_pad, N_PAD)),   # logits
            full((seq_pad, H_PAD)),   # per-step hidden states
        ),
        compiler_params=pltpu.CompilerParams(
            dimension_semantics=("arbitrary",)),   # recurrence is sequential
    )(gi_seq, h0, kp["wh"], kp["bhn"], kp["wdec"], kp["bdec"])

    logits = logits_pad[:seq_len, :N_CHARS]
    h_last = hseq_pad[seq_len - 1, :HIDDEN].reshape(N_LAYERS, 1, HIDDEN)
    return logits, h_last


def rnn_forward(char_idx, hidden, kp):
    """Single-step API (matches RNN.forward(input, hidden)): seq_len = 1."""
    logits, h_new = rnn_forward_seq(char_idx.reshape(1), hidden, kp)
    return logits, h_new


# --------------------------------------------------------------------------- #
# Pure-JAX reference (unpadded, per-step loop) for correctness checking.
# --------------------------------------------------------------------------- #
def rnn_forward_ref(char_indices, hidden, p):
    h = hidden.reshape(1, HIDDEN)
    outs = []
    for t in range(char_indices.shape[0]):
        x = p["emb"][char_indices[t]][None, :]
        r = jax.nn.sigmoid(x @ p["wir"] + p["bir"] + h @ p["whr"] + p["bhr"])
        z = jax.nn.sigmoid(x @ p["wiz"] + p["biz"] + h @ p["whz"] + p["bhz"])
        n = jnp.tanh(x @ p["win"] + p["bin"] + r * (h @ p["whn"] + p["bhn"]))
        h = (1.0 - z) * n + z * h
        outs.append(h @ p["wdec"] + p["bdec"])
    return jnp.concatenate(outs, axis=0), h.reshape(N_LAYERS, 1, HIDDEN)


# --------------------------------------------------------------------------- #
if __name__ == "__main__":
    key = jax.random.PRNGKey(0)
    params = make_params(key)
    kparams = pack_params(params)

    # Example input: an 8-character prime string (RNN.train / evaluate feed one
    # char per step) and init_hidden().
    prime = "Anna Kar"
    char_indices = jnp.array([string.printable.index(c) for c in prime], dtype=jnp.int32)
    hidden0 = jnp.zeros((N_LAYERS, 1, HIDDEN), dtype=jnp.float32)   # RNN.init_hidden()

    logits, hidden1 = rnn_forward_seq(char_indices, hidden0, kparams)
    jax.block_until_ready((logits, hidden1))

    # Correctness vs. pure-JAX reference (full sequence).
    ref_logits, ref_hidden1 = rnn_forward_ref(char_indices, hidden0, params)
    assert logits.shape == (len(prime), N_CHARS)
    assert hidden1.shape == (N_LAYERS, 1, HIDDEN)
    assert jnp.allclose(logits, ref_logits, atol=1e-4, rtol=1e-4)
    assert jnp.allclose(hidden1, ref_hidden1, atol=1e-4, rtol=1e-4)

    # Single-step API, chaining the returned hidden state (as RNN.train would).
    step_logits, hidden2 = rnn_forward(
        jnp.array([string.printable.index("b")], jnp.int32), hidden1, kparams)
    jax.block_until_ready((step_logits, hidden2))
    ref_step_logits, ref_hidden2 = rnn_forward_ref(
        jnp.array([string.printable.index("b")], jnp.int32), ref_hidden1, params)
    assert jnp.allclose(step_logits, ref_step_logits, atol=1e-4, rtol=1e-4)
    assert jnp.allclose(hidden2, ref_hidden2, atol=1e-4, rtol=1e-4)

    # TODO(synk): training loop (CrossEntropyLoss backward + Adam) and the
    # multinomial sampling in evaluate() are not part of the forward kernel.
    print("KERNEL_OK")
</pallas_src>

<mosaic_0001>
module attributes {stable_mosaic.version = 11 : i64} {
  func.func @gru_seq_kernel(%arg0: i32, %arg1: memref<8x384xf32, #tpu.memory_space<vmem>>, %arg2: memref<8x128xf32, #tpu.memory_space<vmem>>, %arg3: memref<128x384xf32, #tpu.memory_space<vmem>>, %arg4: memref<8x128xf32, #tpu.memory_space<vmem>>, %arg5: memref<128x128xf32, #tpu.memory_space<vmem>>, %arg6: memref<8x128xf32, #tpu.memory_space<vmem>>, %arg7: memref<8x128xf32, #tpu.memory_space<vmem>>, %arg8: memref<8x128xf32, #tpu.memory_space<vmem>>) attributes {dimension_semantics = [#tpu.dimension_semantics<arbitrary>], iteration_bounds = array<i64: 1>, scalar_prefetch = 0 : i64, scratch_operands = 0 : i64, tpu.core_type = #tpu.core_type<tc>, window_params = [{pipeline_mode = #tpu.pipeline_mode<synchronous>, transform_indices = @transform_0, window_bounds = array<i64: 8, 384>}, {pipeline_mode = #tpu.pipeline_mode<synchronous>, transform_indices = @transform_1, window_bounds = array<i64: 8, 128>}, {pipeline_mode = #tpu.pipeline_mode<synchronous>, transform_indices = @transform_2, window_bounds = array<i64: 128, 384>}, {pipeline_mode = #tpu.pipeline_mode<synchronous>, transform_indices = @transform_3, window_bounds = array<i64: 8, 128>}, {pipeline_mode = #tpu.pipeline_mode<synchronous>, transform_indices = @transform_4, window_bounds = array<i64: 128, 128>}, {pipeline_mode = #tpu.pipeline_mode<synchronous>, transform_indices = @transform_5, window_bounds = array<i64: 8, 128>}, {pipeline_mode = #tpu.pipeline_mode<synchronous>, transform_indices = @transform_6, window_bounds = array<i64: 8, 128>}, {pipeline_mode = #tpu.pipeline_mode<synchronous>, transform_indices = @transform_7, window_bounds = array<i64: 8, 128>}]} {
    %cst = arith.constant 0.000000e+00 : f32
    %0 = vector.broadcast %cst : f32 to vector<8x128xf32>
    %c0 = arith.constant 0 : index
    %c0_0 = arith.constant 0 : index
    %1 = vector.load %arg8[%c0, %c0_0] : memref<8x128xf32, #tpu.memory_space<vmem>>, vector<8x128xf32>
    tpu.vector_store %arg8[%c0, %c0_0], %0 {strides = array<i32>} : memref<8x128xf32, #tpu.memory_space<vmem>>, vector<8x128xf32>,
    %c0_1 = arith.constant 0 : index
    %c0_2 = arith.constant 0 : index
    %2 = vector.load %arg4[%c0_1, %c0_2] : memref<8x128xf32, #tpu.memory_space<vmem>>, vector<1x128xf32>
    %c0_3 = arith.constant 0 : index
    %c0_4 = arith.constant 0 : index
    %3 = vector.load %arg2[%c0_3, %c0_4] : memref<8x128xf32, #tpu.memory_space<vmem>>, vector<1x128xf32>
    %c0_i32 = arith.constant 0 : i32
    %c8_i32 = arith.constant 8 : i32
    %4 = arith.addi %c0_i32, %c8_i32 : i32
    %c1_i32 = arith.constant 1 : i32
    %5 = scf.for %arg9 = %c0_i32 to %4 step %c1_i32 iter_args(%arg10 = %3) -> (vector<1x128xf32>)  : i32 {
      %13 = arith.index_cast %arg9 : i32 to index
      %c0_15 = arith.constant 0 : index
      %14 = vector.load %arg1[%13, %c0_15] : memref<8x384xf32, #tpu.memory_space<vmem>>, vector<1x384xf32>
      %c0_16 = arith.constant 0 : index
      %c0_17 = arith.constant 0 : index
      %15 = vector.load %arg3[%c0_16, %c0_17] : memref<128x384xf32, #tpu.memory_space<vmem>>, vector<128x384xf32>
      %cst_18 = arith.constant dense<0.000000e+00> : vector<1x384xf32>
      %16 = tpu.matmul %arg10, %15, %cst_18 {dimension_numbers = #tpu.dot_dimension_numbers<[1], [0], [0], [1], [0, 0, 1, 1], [], []>} : vector<1x128xf32>, vector<128x384xf32>, vector<1x384xf32> -> vector<1x384xf32>
      %17 = vector.extract_strided_slice %14 {offsets = [0, 0], sizes = [1, 128], strides = [1, 1]} : vector<1x384xf32> to vector<1x128xf32>
      %18 = vector.extract_strided_slice %16 {offsets = [0, 0], sizes = [1, 128], strides = [1, 1]} : vector<1x384xf32> to vector<1x128xf32>
      %19 = arith.addf %17, %18 : vector<1x128xf32>
      %20 = arith.negf %19 : vector<1x128xf32>
      %21 = math.exp %20 : vector<1x128xf32>
      %cst_19 = arith.constant 1.000000e+00 : f32
      %22 = vector.broadcast %cst_19 : f32 to vector<1x128xf32>
      %23 = arith.addf %22, %21 : vector<1x128xf32>
      %24 = arith.divf %22, %23 : vector<1x128xf32>
      %25 = vector.extract_strided_slice %14 {offsets = [0, 128], sizes = [1, 128], strides = [1, 1]} : vector<1x384xf32> to vector<1x128xf32>
      %26 = vector.extract_strided_slice %16 {offsets = [0, 128], sizes = [1, 128], strides = [1, 1]} : vector<1x384xf32> to vector<1x128xf32>
      %27 = arith.addf %25, %26 : vector<1x128xf32>
      %28 = arith.negf %27 : vector<1x128xf32>
      %29 = math.exp %28 : vector<1x128xf32>
      %cst_20 = arith.constant 1.000000e+00 : f32
      %30 = vector.broadcast %cst_20 : f32 to vector<1x128xf32>
      %31 = arith.addf %30, %29 : vector<1x128xf32>
      %32 = arith.divf %30, %31 : vector<1x128xf32>
      %33 = vector.extract_strided_slice %14 {offsets = [0, 256], sizes = [1, 128], strides = [1, 1]} : vector<1x384xf32> to vector<1x128xf32>
      %34 = vector.extract_strided_slice %16 {offsets = [0, 256], sizes = [1, 128], strides = [1, 1]} : vector<1x384xf32> to vector<1x128xf32>
      %35 = arith.addf %34, %2 : vector<1x128xf32>
      %36 = arith.mulf %24, %35 : vector<1x128xf32>
      %37 = arith.addf %33, %36 : vector<1x128xf32>
      %38 = math.tanh %37 : vector<1x128xf32>
      %39 = arith.subf %arg10, %38 : vector<1x128xf32>
      %40 = arith.mulf %32, %39 : vector<1x128xf32>
      %41 = arith.addf %38, %40 : vector<1x128xf32>
      %42 = arith.index_cast %arg9 : i32 to index
      %c0_21 = arith.constant 0 : index
      %43 = vector.load %arg8[%42, %c0_21] : memref<8x128xf32, #tpu.memory_space<vmem>>, vector<1x128xf32>
      tpu.vector_store %arg8[%42, %c0_21], %41 {strides = array<i32>} : memref<8x128xf32, #tpu.memory_space<vmem>>, vector<1x128xf32>,
      scf.yield %41 : vector<1x128xf32>
    }
    %c8_i32_5 = arith.constant 8 : i32
    %c0_6 = arith.constant 0 : index
    %c0_7 = arith.constant 0 : index
    %6 = vector.load %arg8[%c0_6, %c0_7] : memref<8x128xf32, #tpu.memory_space<vmem>>, vector<8x128xf32>
    %c0_8 = arith.constant 0 : index
    %c0_9 = arith.constant 0 : index
    %7 = vector.load %arg5[%c0_8, %c0_9] : memref<128x128xf32, #tpu.memory_space<vmem>>, vector<128x128xf32>
    %cst_10 = arith.constant dense<0.000000e+00> : vector<8x128xf32>
    %8 = tpu.matmul %6, %7, %cst_10 {dimension_numbers = #tpu.dot_dimension_numbers<[1], [0], [0], [1], [0, 0, 1, 1], [], []>} : vector<8x128xf32>, vector<128x128xf32>, vector<8x128xf32> -> vector<8x128xf32>
    %c0_11 = arith.constant 0 : index
    %c0_12 = arith.constant 0 : index
    %9 = vector.load %arg6[%c0_11, %c0_12] : memref<8x128xf32, #tpu.memory_space<vmem>>, vector<1x128xf32>
    %10 = vector.broadcast %9 : vector<1x128xf32> to vector<8x128xf32>
    %11 = arith.addf %8, %10 : vector<8x128xf32>
    %c0_13 = arith.constant 0 : index
    %c0_14 = arith.constant 0 : index
    %12 = vector.load %arg7[%c0_13, %c0_14] : memref<8x128xf32, #tpu.memory_space<vmem>>, vector<8x128xf32>
    tpu.vector_store %arg7[%c0_13, %c0_14], %11 {strides = array<i32>} : memref<8x128xf32, #tpu.memory_space<vmem>>, vector<8x128xf32>,
    return
  }
  func.func @transform_0(%arg0: i32) -> (i32, i32) {
    %c0_i32 = arith.constant 0 : i32
    %c0_i32_0 = arith.constant 0 : i32
    %c0_i32_1 = arith.constant 0 : i32
    return %c0_i32, %c0_i32_0 : i32, i32
  }
  func.func @transform_1(%arg0: i32) -> (i32, i32) {
    %c0_i32 = arith.constant 0 : i32
    %c0_i32_0 = arith.constant 0 : i32
    %c0_i32_1 = arith.constant 0 : i32
    return %c0_i32, %c0_i32_0 : i32, i32
  }
  func.func @transform_2(%arg0: i32) -> (i32, i32) {
    %c0_i32 = arith.constant 0 : i32
    %c0_i32_0 = arith.constant 0 : i32
    %c0_i32_1 = arith.constant 0 : i32
    return %c0_i32, %c0_i32_0 : i32, i32
  }
  func.func @transform_3(%arg0: i32) -> (i32, i32) {
    %c0_i32 = arith.constant 0 : i32
    %c0_i32_0 = arith.constant 0 : i32
    %c0_i32_1 = arith.constant 0 : i32
    return %c0_i32, %c0_i32_0 : i32, i32
  }
  func.func @transform_4(%arg0: i32) -> (i32, i32) {
    %c0_i32 = arith.constant 0 : i32
    %c0_i32_0 = arith.constant 0 : i32
    %c0_i32_1 = arith.constant 0 : i32
    return %c0_i32, %c0_i32_0 : i32, i32
  }
  func.func @transform_5(%arg0: i32) -> (i32, i32) {
    %c0_i32 = arith.constant 0 : i32
    %c0_i32_0 = arith.constant 0 : i32
    %c0_i32_1 = arith.constant 0 : i32
    return %c0_i32, %c0_i32_0 : i32, i32
  }
  func.func @transform_6(%arg0: i32) -> (i32, i32) {
    %c0_i32 = arith.constant 0 : i32
    %c0_i32_0 = arith.constant 0 : i32
    %c0_i32_1 = arith.constant 0 : i32
    return %c0_i32, %c0_i32_0 : i32, i32
  }
  func.func @transform_7(%arg0: i32) -> (i32, i32) {
    %c0_i32 = arith.constant 0 : i32
    %c0_i32_0 = arith.constant 0 : i32
    %c0_i32_1 = arith.constant 0 : i32
    return %c0_i32, %c0_i32_0 : i32, i32
  }
}

</mosaic_0001>

<bundles_post_ra>
// kernel: tpu_custom_call.1
= control target key start
LH: loop header
LB: loop body
LE: loop exit
PB: predicated region body
PF: predicated region fallthrough
CT: control target
= control target key end

     0   :  { %13 = vsyncpa [#allocation3], 0  ;;  %s1006_s0 = inlined_call_operand.hbm [shape: f32[8,384], index: 0, kind: input, shape index: {}]   ;;  %s1007_s1 = inlined_call_operand.hbm [shape: f32[8,128], index: 1, kind: input, shape index: {}]   ;;  %s1008_s2 = inlined_call_operand.hbm [shape: f32[128,384], index: 2, kind: input, shape index: {}]   ;;  %s1009_s3 = inlined_call_operand.vmem [shape: f32[8,128], index: 3, kind: input, shape index: {}]   ;;  %s1010_s4 = inlined_call_operand.hbm [shape: f32[128,128], index: 4, kind: input, shape index: {}]   ;;  %s1011_s5 = inlined_call_operand.vmem [shape: f32[8,128], index: 5, kind: input, shape index: {}]   ;;  %s1012_s6 = inlined_call_operand.hbm [shape: f32[8,128], index: 6, kind: output, shape index: {0}]   ;;  %s1013_s7 = inlined_call_operand.hbm [shape: f32[8,128], index: 7, kind: output, shape index: {1}]  }
   0x1   :  { %14 = vsyncpa [#allocation6], 0 }
   0x2   :  { %15 = vsyncpa [#allocation9], 0 }
   0x3   :  { %16 = vsyncpa [#allocation4], 0 }
   0x4   :  { %17 = vsyncpa [#allocation12], 0  ;;  %s838_s24 = smov [#allocation5]   ;;  %s839_s26 = smov [#allocation2]  }
   0x5   :  { %s34_s25 = sshll.u32 %s838_s24, 4  ;;  %s24_s27 = sshll.u32 %s839_s26, 4  ;;  %s35_s25 = int_to_ptr.vmem [resolvable:$true] %s34_s25  ;;  %s25_s27 = int_to_ptr.vmem [resolvable:$true] %s24_s27 }
   0x6   :  { %s680_s30 = scalar_lea.hbm %s1007_s1, 128 }
   0x7   :  { %p681_p0 = scmp.ne.s32.totalorder %s1007_s1, %s680_s30  ;;  %p684_p1 = scmp.lt.u32.totalorder %s680_s30, %s1007_s1 }
   0x9   :  { %p686_p2 = pnand %p684_p1, %p681_p0 }
   0xb   :  { %689 = shalt.err (!%p686_p2)
}
   0xc   :  { %s690_s12 = scalar_lea.vmem %s35_s25, 128  ;;  %p695_p4 = scmp.lt.s32.totalorder %s35_s25, %s35_s25 }
   0xd   :  { %p691_p3 = scmp.ne.s32.totalorder %s35_s25, %s690_s12  ;;  %p696_p5 = scmp.lt.s32.totalorder %s690_s12, %s690_s12 }
   0xf   :  { %p697_p6 = por %p696_p5, %p695_p4 }
  0x11   :  { %p698_p7 = pnand %p697_p6, %p691_p3 }
  0x13   :  { %701 = shalt.err (!%p698_p7)
}
  0x14   :  { %37 = dma.hbm_to_vmem [thread:$0]  %s1007_s1, 128, %s35_s25, [#allocation6]  }
  0x15   :  { %s702_s17 = scalar_lea.hbm %s1006_s0, 384 }
  0x16   :  { %p703_p8 = scmp.ne.s32.totalorder %s1006_s0, %s702_s17  ;;  %p706_p9 = scmp.lt.u32.totalorder %s702_s17, %s1006_s0 }
  0x18   :  { %p708_p10 = pnand %p706_p9, %p703_p8 }
  0x1a   :  { %711 = shalt.err (!%p708_p10)
}
  0x1b   :  { %s712_s22 = scalar_lea.vmem %s25_s27, 384  ;;  %p717_p12 = scmp.lt.s32.totalorder %s25_s27, %s25_s27 }
  0x1c   :  { %p713_p11 = scmp.ne.s32.totalorder %s25_s27, %s712_s22  ;;  %p718_p13 = scmp.lt.s32.totalorder %s712_s22, %s712_s22 }
  0x1e   :  { %p719_p0 = por %p718_p13, %p717_p12 }
  0x20   :  { %p720_p1 = pnand %p719_p0, %p713_p11 }
  0x22   :  { %723 = shalt.err (!%p720_p1)
}
  0x23   :  { %27 = dma.hbm_to_vmem [thread:$0]  %s1006_s0, 384, %s25_s27, [#allocation3]  }
  0x24   :  { %s840_s24 = smov [#allocation7]   ;;  %s724_s29 = scalar_lea.hbm %s1008_s2, 6144 }
  0x25   :  { %s43_s25 = sshll.u32 %s840_s24, 4  ;;  %p725_p2 = scmp.ne.s32.totalorder %s1008_s2, %s724_s29  ;;  %s44_s25 = int_to_ptr.vmem [resolvable:$true] %s43_s25 }
  0x26   :  { %p728_p3 = scmp.lt.u32.totalorder %s724_s29, %s1008_s2 }
  0x28   :  { %p730_p4 = pnand %p728_p3, %p725_p2 }
  0x2a   :  { %733 = shalt.err (!%p730_p4)
}
  0x2b   :  { %s734_s11 = scalar_lea.vmem %s44_s25, 6144  ;;  %p739_p6 = scmp.lt.s32.totalorder %s44_s25, %s44_s25 }
  0x2c   :  { %p735_p5 = scmp.ne.s32.totalorder %s44_s25, %s734_s11  ;;  %p740_p7 = scmp.lt.s32.totalorder %s734_s11, %s734_s11 }
  0x2e   :  { %p741_p8 = por %p740_p7, %p739_p6 }
  0x30   :  { %p742_p9 = pnand %p741_p8, %p735_p5 }
  0x32   :  { %745 = shalt.err (!%p742_p9)
}
  0x33   :  { %s841_s0 = smov 384   ;;  %s842_s27 = smov 24  }
  0x34   :  { %49 = dma.hbm_to_vmem [thread:$0]  %s1008_s2, 6144, %s44_s25, [#allocation6], %s841_s0, %s841_s0, %s842_s27  }
  0x35   :  { %s843_s14 = smov [#allocation8]   ;;  %s746_s18 = scalar_lea.hbm %s1010_s4, 2048 }
  0x36   :  { %s57_s15 = sshll.u32 %s843_s14, 4  ;;  %p747_p10 = scmp.ne.s32.totalorder %s1010_s4, %s746_s18  ;;  %s58_s15 = int_to_ptr.vmem [resolvable:$true] %s57_s15 }
  0x37   :  { %p750_p11 = scmp.lt.u32.totalorder %s746_s18, %s1010_s4 }
  0x39   :  { %p752_p12 = pnand %p750_p11, %p747_p10 }
  0x3b   :  { %755 = shalt.err (!%p752_p12)
}
  0x3c   :  { %s756_s1 = scalar_lea.vmem %s58_s15, 2048  ;;  %p761_p0 = scmp.lt.s32.totalorder %s58_s15, %s58_s15 }
  0x3d   :  { %p757_p13 = scmp.ne.s32.totalorder %s58_s15, %s756_s1  ;;  %p762_p1 = scmp.lt.s32.totalorder %s756_s1, %s756_s1 }
  0x3f   :  { %p763_p2 = por %p762_p1, %p761_p0 }
  0x41   :  { %p764_p3 = pnand %p763_p2, %p757_p13 }
  0x43   :  { %767 = shalt.err (!%p764_p3)
}
  0x44   :  { %s844_s2 = smov 128   ;;  %s845_s23 = smov 8  }
  0x45   :  { %63 = dma.hbm_to_vmem [thread:$0]  %s1010_s4, 2048, %s58_s15, [#allocation9], %s844_s2, %s844_s2, %s845_s23  }
  0x46   :  { %820 = dma.done.wait [#allocation3], 384  }
  0x47   :  { %821 = vsyncadd [#allocation3], 4294966912 }
  0x48   :  { %822 = dma.done.wait [#allocation6], 6272  }
  0x49   :  { %823 = vsyncadd [#allocation6], 4294961024 }
  0x4a   :  { %824 = dma.done.wait [#allocation9], 2048  }
  0x4b   :  { %825 = vsyncadd [#allocation9], 4294965248  ;;  %v846_v0 = vmov 0.0   ;;  %v946_v1 = vld [vmem:[%s1009_s3] sm:$0x1]  ;;  %s950_s29 = smov 0  }
  0x4c   :  { %78 = vst [vmem:[#allocation11] sm:$0xff] %v846_v0  ;;  %v80_v2 = vld [vmem:[#allocation5] sm:$0x1]  }
  0x4d LB: > { %v98_v3 = vld [vmem:[#allocation7 + $0x8] sm:$0xff]  ;;  %v101_v4 = vld [vmem:[#allocation7 + $0x20] sm:$0xff]  ;;  %v100_v7 = vld [vmem:[#allocation7 + $0x18] sm:$0xff]  ;;  %v847_v10 = vmov 0.0|0.0   ;;  %v848_v11 = vmov 0.0   ;;  %vm849_vm0 = vmmov 0   ;;  %s836_s29 = sphi %s950_s29, %s86_s29   ;;  %v832_v2 = vphi %v80_v2, %v311_v2  }
  0x4e   : > { %v97_v5 = vld [vmem:[#allocation7] sm:$0xff]  ;;  %v558_v6 = vpack.c.bf16 %v101_v4, %v98_v3  ;;  %v104_v8 = vld [vmem:[#allocation7 + $0x38] sm:$0xff]  ;;  %v107_v9 = vld [vmem:[#allocation7 + $0x50] sm:$0xff]  ;;  %590 = vmatprep.subr.bf16.mxu1 %v847_v10  ;;  %209 = vmatprep.mubr.f32.mxu0 %v848_v11  ;;  %s88_s3 = sshra.s32 %s836_s29, 3  ;;  %s91_s30 = sand.u32 7, %s836_s29 }
  0x4f   : > { %v560_v12 = vpack.c.bf16 %v100_v7, %v97_v5  ;;  %v562_v13 = vpack.c.bf16 %v107_v9, %v104_v8  ;;  %v103_v14 = vld [vmem:[#allocation7 + $0x30] sm:$0xff]  ;;  %v106_v15 = vld [vmem:[#allocation7 + $0x48] sm:$0xff]  ;;  %520 = vmatprep.mubr.msk.f32.mxu1 %vm849_vm0, %v848_v11  ;;  %v113_v17 = vld [vmem:[#allocation7 + $0x80] sm:$0xff]  ;;  %s450_s4 = smul.u32 24, %s88_s3  ;;  %s312_s10 = scalar_lea.vmem [#allocation11], %s836_s29 }
  0x50   : > { %v110_v16 = vld [vmem:[#allocation7 + $0x68] sm:$0xff]  ;;  %559 = vmatprep.subr.bf16.mxu0 %v558_v6  ;;  %v564_v18 = vpack.c.bf16 %v106_v15, %v103_v14  ;;  %v109_v20 = vld [vmem:[#allocation7 + $0x60] sm:$0xff]  ;;  %v112_v21 = vld [vmem:[#allocation7 + $0x78] sm:$0xff]  ;;  %s86_s29 = sadd.s32 1, %s836_s29  }
  0x51   : > { %561 = vmatpush1.bf16.msra.mxu0 %v560_v12  ;;  %v566_v19 = vpack.c.bf16 %v113_v17, %v110_v16  ;;  %v116_v22 = vld [vmem:[#allocation7 + $0x98] sm:$0xff]  ;;  %v119_v23 = vld [vmem:[#allocation7 + $0xb0] sm:$0xff]  ;;  %v568_v24 = vpack.c.bf16 %v112_v21, %v109_v20  ;;  %v118_v27 = vld [vmem:[#allocation7 + $0xa8] sm:$0xff]  ;;  %s94_s8 = sadd.s32 %s450_s4, %s91_s30  ;;  %p83_p4 = scmp.ge.s32.totalorder %s86_s29, 8  }
  0x52   : > { %563 = vmatprep.subr.bf16.mxu0 %v562_v13  ;;  %v115_v25 = vld [vmem:[#allocation7 + $0x90] sm:$0xff]  ;;  %v570_v26 = vpack.c.bf16 %v119_v23, %v116_v22  ;;  %v102_v29 = vld [vmem:[#allocation7 + $0x28] sm:$0xff]  ;;  %v125_v31 = vld [vmem:[#allocation7 + $0xe0] sm:$0xff]  ;;  %s95_s9 = scalar_lea.vmem [#allocation2], %s94_s8  ;;  %vm851_vm1 = vmmov (%p83_p4), 0   ;;  %s852_s11 = smov (%p83_p4), [#allocation11]  }
  0x53   : > { %v99_v28 = vld [vmem:[#allocation7 + $0x10] sm:$0xff]  ;;  %v122_v30 = vld [vmem:[#allocation7 + $0xc8] sm:$0xff]  ;;  %v105_v33 = vld [vmem:[#allocation7 + $0x40] sm:$0xff]  ;;  %v572_v35 = vpack.c.bf16 %v118_v27, %v115_v25  ;;  %s423_s0 = sshll.u32 (%p83_p4), %s852_s11, 4  ;;  %s424_s0 = int_to_ptr.vmem [resolvable:$true] %s423_s0 }
  0x54   : > { %v591_v32 = vpack.c.bf16 %v102_v29, %v99_v28  ;;  %v108_v34 = vld [vmem:[#allocation7 + $0x58] sm:$0xff]  ;;  %v121_v36 = vld [vmem:[#allocation7 + $0xc0] sm:$0xff]  ;;  %v574_v38 = vpack.c.bf16 %v125_v31, %v122_v30  ;;  %v111_v40 = vld [vmem:[#allocation7 + $0x70] sm:$0xff]  ;;  %s768_s27 = scalar_lea.vmem (%p83_p4), %s424_s0, 128  ;;  %p773_p6 = scmp.lt.s32.totalorder (%p83_p4), %s424_s0, %s424_s0 }
  0x55   : > { %565 = vmatpush1.bf16.msra.mxu0 %v564_v18  ;;  %v594_v37 = vpack.c.bf16 %v108_v34, %v105_v33  ;;  %v124_v39 = vld [vmem:[#allocation7 + $0xd8] sm:$0xff]  ;;  %v114_v41 = vld [vmem:[#allocation7 + $0x88] sm:$0xff]  ;;  %v131_v43 = vld [vmem:[#allocation7 + $0x110] sm:$0xff]  ;;  %p769_p5 = scmp.ne.s32.totalorder (%p83_p4), %s424_s0, %s768_s27  ;;  %p774_p7 = scmp.lt.s32.totalorder (%p83_p4), %s768_s27, %s768_s27 }
  0x56   : > { %567 = vmatprep.subr.bf16.mxu0 %v566_v19  ;;  %592 = vmatpush3.bf16.msra.mxu1 %v591_v32  ;;  %v128_v42 = vld [vmem:[#allocation7 + $0xf8] sm:$0xff]  ;;  %v576_v44 = vpack.c.bf16 %v124_v39, %v121_v36  ;;  %v127_v45 = vld [vmem:[#allocation7 + $0xf0] sm:$0xff]  ;;  %v597_v46 = vpack.c.bf16 %v114_v41, %v111_v40  ;;  %v130_v48 = vld [vmem:[#allocation7 + $0x108] sm:$0xff] }
  0x57   : > { %593 = vmatprep.subr.bf16.mxu1 %v847_v10  ;;  %v578_v47 = vpack.c.bf16 %v131_v43, %v128_v42  ;;  %v117_v49 = vld [vmem:[#allocation7 + $0xa0] sm:$0xff]  ;;  %v120_v50 = vld [vmem:[#allocation7 + $0xb8] sm:$0xff]  ;;  %v134_v51 = vld [vmem:[#allocation7 + $0x128] sm:$0xff]  ;;  %v580_v53 = vpack.c.bf16 %v130_v48, %v127_v45  ;;  %v850_v42 = vmov (%p83_p4), 0.0|0.0   ;;  %p775_p8 = por (%p83_p4), %p774_p7, %p773_p6 }
  0x58   : > { %v137_v52 = vld [vmem:[#allocation7 + $0x140] sm:$0xff]  ;;  %v600_v55 = vpack.c.bf16 %v120_v50, %v117_v49  ;;  %v136_v57 = vld [vmem:[#allocation7 + $0x138] sm:$0xff]  ;;  %v123_v58 = vld [vmem:[#allocation7 + $0xd0] sm:$0xff] }
  0x59   : > { %569 = vmatpush1.bf16.msra.mxu0 %v568_v24  ;;  %v133_v54 = vld [vmem:[#allocation7 + $0x120] sm:$0xff]  ;;  %v582_v56 = vpack.c.bf16 %v137_v52, %v134_v51  ;;  %v126_v59 = vld [vmem:[#allocation7 + $0xe8] sm:$0xff]  ;;  %v140_v60 = vld [vmem:[#allocation7 + $0x158] sm:$0xff]  ;;  %p776_p9 = pnand (%p83_p4), %p775_p8, %p769_p5 }
  0x5a   : > { %571 = vmatprep.subr.bf16.mxu0 %v570_v26  ;;  %595 = vmatpush3.bf16.msra.mxu1 %v594_v37  ;;  %v143_v61 = vld [vmem:[#allocation7 + $0x170] sm:$0xff]  ;;  %v584_v62 = vpack.c.bf16 %v136_v57, %v133_v54  ;;  %v603_v3 = vpack.c.bf16 %v126_v59, %v123_v58  ;;  %v142_v5 = vld [vmem:[#allocation7 + $0x168] sm:$0xff]  ;;  %v129_v6 = vld [vmem:[#allocation7 + $0x100] sm:$0xff] }
  0x5b   : > { %596 = vmatprep.subr.bf16.mxu1 %v847_v10  ;;  %v139_v63 = vld [vmem:[#allocation7 + $0x150] sm:$0xff]  ;;  %v586_v4 = vpack.c.bf16 %v143_v61, %v140_v60  ;;  %v132_v7 = vld [vmem:[#allocation7 + $0x118] sm:$0xff]  ;;  %v138_v12 = vld [vmem:[#allocation7 + $0x148] sm:$0xff] }
  0x5c   : > { %v588_v8 = vpack.c.bf16 %v142_v5, %v139_v63  ;;  %v606_v9 = vpack.c.bf16 %v132_v7, %v129_v6  ;;  %v135_v11 = vld [vmem:[#allocation7 + $0x130] sm:$0xff]  ;;  %v141_v14 = vld [vmem:[#allocation7 + $0x160] sm:$0xff]  ;;  %v144_v15 = vld [vmem:[#allocation7 + $0x178] sm:$0xff] }
  0x5d   : > { %573 = vmatpush1.bf16.msra.mxu0 %v572_v35  ;;  %v609_v13 = vpack.c.bf16 %v138_v12, %v135_v11  ;;  %v612_v16 = vpack.c.bf16 %v144_v15, %v141_v14  ;;  %v96_v17 = vld [vmem:[%s95_s9] ss:$8 sm:$0x7]  ;;  %v322_v49 = vld [vmem:[#allocation8 + $0x38] sm:$0xff] (%p83_p4) }
  0x5e   : > { %575 = vmatprep.subr.bf16.mxu0 %v574_v38  ;;  %598 = vmatpush3.bf16.msra.mxu1 %v597_v46  ;;  %v294_v22 = vrot.slane %v96_v17, 1  ;;  %v305_v30 = vrot.slane %v96_v17, 2  ;;  %v315_v39 = vld [vmem:[#allocation8] sm:$0xff] (%p83_p4)  ;;  %v316_v40 = vld [vmem:[#allocation8 + $0x8] sm:$0xff] (%p83_p4)  ;;  %v317_v41 = vld [vmem:[#allocation8 + $0x10] sm:$0xff] (%p83_p4) }
  0x5f   : > { %599 = vmatprep.subr.bf16.mxu1 %v847_v10  ;;  %v615_v43 = vpack.c.bf16 (%p83_p4), %v316_v40, %v315_v39  ;;  %v319_v46 = vld [vmem:[#allocation8 + $0x20] sm:$0xff] (%p83_p4)  ;;  %v321_v48 = vld [vmem:[#allocation8 + $0x30] sm:$0xff] (%p83_p4)  ;;  %v324_v51 = vld [vmem:[#allocation8 + $0x48] sm:$0xff] (%p83_p4) }
  0x60   :  { %v323_v50 = vld [vmem:[#allocation8 + $0x40] sm:$0xff] (%p83_p4)  ;;  %v329_v58 = vld [vmem:[#allocation8 + $0x70] sm:$0xff] (%p83_p4)  ;;  %v330_v59 = vld [vmem:[#allocation8 + $0x78] sm:$0xff] (%p83_p4) }
  0x61   : > { %577 = vmatpush1.bf16.msra.mxu0 %v576_v44  ;;  %v318_v44 = vld [vmem:[#allocation8 + $0x18] sm:$0xff] (%p83_p4)  ;;  %v627_v52 = vpack.c.bf16 (%p83_p4), %v324_v51, %v323_v50  ;;  %v636_v60 = vpack.c.bf16 (%p83_p4), %v330_v59, %v329_v58 }
  0x62   : > { %579 = vmatprep.subr.bf16.mxu0 %v578_v47  ;;  %601 = vmatpush3.bf16.msra.mxu1 %v600_v55  ;;  %v618_v45 = vpack.c.bf16 (%p83_p4), %v318_v44, %v317_v41  ;;  %v320_v47 = vld [vmem:[#allocation8 + $0x28] sm:$0xff] (%p83_p4)  ;;  %v327_v55 = vld [vmem:[#allocation8 + $0x60] sm:$0xff] (%p83_p4) }
  0x63   : > { %602 = vmatprep.subr.bf16.mxu1 %v847_v10 }
  0x65   : > { %581 = vmatpush1.bf16.msra.mxu0 %v580_v53  ;;  %v325_v53 = vld [vmem:[#allocation8 + $0x50] sm:$0xff] (%p83_p4) }
  0x66   : > { %583 = vmatprep.subr.bf16.mxu0 %v582_v56  ;;  %604 = vmatpush3.bf16.msra.mxu1 %v603_v3  ;;  %v328_v56 = vld [vmem:[#allocation8 + $0x68] sm:$0xff] (%p83_p4) }
  0x67   : > { %605 = vmatprep.subr.bf16.mxu1 %v847_v10  ;;  %v633_v57 = vpack.c.bf16 (%p83_p4), %v328_v56, %v327_v55 }
  0x69   : > { %585 = vmatpush1.bf16.msra.mxu0 %v584_v62 }
  0x6a   : > { %587 = vmatprep.subr.bf16.mxu0 %v586_v4  ;;  %607 = vmatpush3.bf16.msra.mxu1 %v606_v9 }
  0x6b   : > { %608 = vmatprep.subr.bf16.mxu1 %v847_v10 }
  0x6d   : > { %589 = vmatpush1.bf16.msra.mxu0 %v588_v8 }
  0x6e   : > { %610 = vmatpush3.bf16.msra.mxu1 %v609_v13  ;;  %614 = vmatprep.subr.bf16.mxu0 (%p83_p4), %v850_v42 }
  0x6f   : > { %611 = vmatprep.subr.bf16.mxu1 %v847_v10 }
  0x70   : > { %210 = vmatmul.mubr.f32.vlgmr.msra.gmra.mrb[0].mxu0 %v832_v2 }
  0x71   :  { %555 = vmatprep.mubr.msk.f32.mxu0 (%p83_p4), %vm851_vm1, %v846_v0  ;;  %616 = vmatpush3.bf16.msra.mxu0 (%p83_p4), %v615_v43  ;;  %v326_v0 = vld [vmem:[#allocation8 + $0x58] sm:$0xff] (%p83_p4) }
  0x72   : > { %613 = vmatpush3.bf16.msra.mxu1 %v612_v16  ;;  %617 = vmatprep.subr.bf16.mxu0 (%p83_p4), %v850_v42  ;;  %v630_v54 = vpack.c.bf16 (%p83_p4), %v326_v0, %v325_v53 }
  0x75   : > { %521 = vmatmul.mubr.f32.vlgmr.msra.gmra.mrb[0].mxu1 %v832_v2  ;;  %619 = vmatpush3.bf16.msra.mxu0 (%p83_p4), %v618_v45 }
  0x76   :  { %620 = vmatprep.subr.bf16.mxu0 (%p83_p4), %v850_v42 }
 0x143   : > { %v211_v18 = vpop.f32.mrb[0].mxu0 }
 0x144   : > { %v286_v19 = vadd.f32 %v211_v18, %v96_v17  ;;  %v213_v20 = vpop.f32.mrb[1].mxu0 }
 0x145   : > { %v296_v24 = vadd.f32 %v294_v22, %v213_v20 }
 0x146   : > { %v451_v21 = vmul.f32 -1.442695, %v286_v19 }
 0x147   : > { %v452_v26 = vmul.f32 -1.442695, %v296_v24 }
 0x148   : > { %670 = vpow2.f32 %v451_v21  ;;  %v282_v23 = vpop.f32.mrb[0].mxu1 }
 0x149   : > { %v522_v25 = vpop.f32.mrb[1].mxu1  ;;  %672 = vpow2.f32 %v452_v26  ;;  %v303_v28 = vadd.f32 %v282_v23, %v946_v1  ;;  %v624_v1 = vpack.c.bf16 (%p83_p4), %v322_v49, %v321_v48 }
 0x152   : > { %v671_v10 = vpop.eup %670 }
 0x153   : > { %v290_v27 = vadd.f32 1.0, %v671_v10  ;;  %v673_v29 = vpop.eup %672 }
 0x154   : > { %v300_v33 = vadd.f32 1.0, %v673_v29 }
 0x155   : > { %674 = vrcp.f32 %v290_v27 }
 0x15f   : > { %v675_v31 = vpop.eup %674 }
 0x160   : > { %v304_v32 = vmul.f32 %v675_v31, %v303_v28 }
 0x162   : > { %v307_v34 = vadd.f32 %v305_v30, %v304_v32 }
 0x164   : > { %676 = vtanh.f32 %v307_v34 }
 0x165   : > { %678 = vrcp.f32 %v300_v33 }
 0x16e   : > { %v677_v35 = vpop.eup %676 }
 0x16f   : > { %v309_v36 = vsub.f32 %v832_v2, %v677_v35  ;;  %v679_v37 = vpop.eup %678  ;;  %85 = sbr.rel (!%p83_p4) target bundleno = 77 (0x4d), region = 77 }
 0x171   : > { %v310_v38 = vmul.f32 %v679_v37, %v309_v36 }
 0x173   : > { %v311_v2 = vadd.f32 %v677_v35, %v310_v38  }
 0x175   : > { %313 = vst [vmem:[%s312_s10] sm:$0x1] %v311_v2  ;;  %v621_v2 = vpack.c.bf16 (%p83_p4), %v320_v47, %v319_v46 }
 0x177   :  { %622 = vmatpush3.bf16.msra.mxu0 %v621_v2 }
 0x178   :  { %623 = vmatprep.subr.bf16.mxu0 %v850_v42 }
 0x17b   :  { %625 = vmatpush3.bf16.msra.mxu0 %v624_v1 }
 0x17c   :  { %626 = vmatprep.subr.bf16.mxu0 %v850_v42  ;;  %v314_v61 = vld [vmem:[#allocation11] sm:$0xff] }
 0x17f   :  { %628 = vmatpush3.bf16.msra.mxu0 %v627_v52 }
 0x180   :  { %629 = vmatprep.subr.bf16.mxu0 %v850_v42 }
 0x183   :  { %631 = vmatpush3.bf16.msra.mxu0 %v630_v54 }
 0x184   :  { %632 = vmatprep.subr.bf16.mxu0 %v850_v42 }
 0x187   :  { %634 = vmatpush3.bf16.msra.mxu0 %v633_v57 }
 0x188   :  { %635 = vmatprep.subr.bf16.mxu0 %v850_v42 }
 0x18b   :  { %637 = vmatpush3.bf16.msra.mxu0 %v636_v60 }
 0x18e   :  { %556 = vmatmul.mubr.f32.vlgmr.msra.gmra.mrb[0].mxu0 %v314_v61 }
 0x18f   :  { %779 = shalt.err (!%p776_p9)
}
 0x190   :  { %s780_s14 = scalar_lea.hbm %s1013_s7, 128 }
 0x191   :  { %p781_p10 = scmp.ne.s32.totalorder %s1013_s7, %s780_s14  ;;  %p784_p11 = scmp.lt.u32.totalorder %s780_s14, %s1013_s7 }
 0x193   :  { %p786_p12 = pnand %p784_p11, %p781_p10 }
 0x195   :  { %789 = shalt.err (!%p786_p12)
}
 0x196   :  { %426 = dma.vmem_to_hbm [thread:$0]  %s424_s0, 128, %s1013_s7, [#allocation12]   ;;  %v453_v62 = vld [vmem:[%s1011_s5] ss:$0 sm:$0xff] }
 0x197   :  { %s853_s1 = smov [#allocation10]  }
 0x198   :  { %s413_s2 = sshll.u32 %s853_s1, 4  ;;  %s414_s2 = int_to_ptr.vmem [resolvable:$true] %s413_s2 }
 0x199   :  { %s790_s23 = scalar_lea.vmem %s414_s2, 128  ;;  %p795_p0 = scmp.lt.s32.totalorder %s414_s2, %s414_s2 }
 0x19a   :  { %p791_p13 = scmp.ne.s32.totalorder %s414_s2, %s790_s23  ;;  %p796_p1 = scmp.lt.s32.totalorder %s790_s23, %s790_s23 }
 0x19c   :  { %p797_p2 = por %p796_p1, %p795_p0 }
 0x19e   :  { %p798_p3 = pnand %p797_p2, %p791_p13 }
 0x261   :  { %v402_v63 = vpop.f32.mrb[0].mxu0 }
 0x262   :  { %v403_v3 = vadd.f32 %v453_v62, %v402_v63  ;;  %v557_v4 = vpop.f32.mrb[1].mxu0 }
 0x264   :  { %406 = vst [vmem:[#allocation10] sm:$0xff] %v403_v3 }
 0x265   :  { %801 = shalt.err (!%p798_p3)
}
 0x266   :  { %s802_s25 = scalar_lea.hbm %s1012_s6, 128 }
 0x267   :  { %p803_p4 = scmp.ne.s32.totalorder %s1012_s6, %s802_s25  ;;  %p806_p5 = scmp.lt.u32.totalorder %s802_s25, %s1012_s6 }
 0x269   :  { %p808_p6 = pnand %p806_p5, %p803_p4 }
 0x26b   :  { %811 = shalt.err (!%p808_p6)
}
 0x26c   :  { %416 = dma.vmem_to_hbm [thread:$0]  %s414_s2, 128, %s1012_s6, [#allocation4]  }
 0x26d   :  { %826 = dma.done.wait [#allocation4], 128  }
 0x26e   :  { %827 = vsyncadd [#allocation4], 4294967168 }
 0x26f   :  { %828 = dma.done.wait [#allocation12], 128  }
 0x270   :  { %829 = vsyncadd [#allocation12], 4294967168 }
 0x271   :  { %433 = vsyncpa [#allocation3], 1 }
 0x272   :  { %434 = vsyncpa [#allocation6], 1 }
 0x273   :  { %435 = vsyncpa [#allocation9], 1 }
 0x274   :  { %436 = vsyncpa [#allocation4], 1 }
 0x275   :  { %437 = vsyncpa [#allocation12], 1 }

</bundles_post_ra>
